<compile_context>
chip_gen: v6e
topology: v6e:2x2x1
jax: 0.10.0
libtpu: 0.0.40
codegen_flags: <defaults>
</compile_context>

<pallas_src>
import functools

import jax
import jax.numpy as jnp
from jax.experimental import pallas as pl
from jax.experimental.pallas import tpu as pltpu


def _round_up(n, m):
    return ((n + m - 1) // m) * m


def mlp_kernel(x_ref, wb0_ref, wb1_ref, wb2_ref, wb3_ref, o_ref):
    """One lane-dense batch tile of the full 4-layer MLP forward.

    x_ref:  (input_size, bt)   -- batch on the lane axis
    wb_i:   (out_i, in_i + 1)  -- packed [W^T | b] for layer i
    o_ref:  (1, bt)            -- lane-dense output block
    """
    x = x_ref[...]                                                   # (in, bt)

    # Layer 0: Linear(input_size, 8) + ReLU
    wb0 = wb0_ref[...]
    h = jnp.dot(wb0[:, :-1], x, preferred_element_type=jnp.float32) + wb0[:, -1:]
    h = jnp.maximum(h, 0.0)

    # Layer 1: Linear(8, 8) + ReLU
    wb1 = wb1_ref[...]
    h = jnp.dot(wb1[:, :-1], h, preferred_element_type=jnp.float32) + wb1[:, -1:]
    h = jnp.maximum(h, 0.0)

    # Layer 2: Linear(8, 8) + ReLU
    wb2 = wb2_ref[...]
    h = jnp.dot(wb2[:, :-1], h, preferred_element_type=jnp.float32) + wb2[:, -1:]
    h = jnp.maximum(h, 0.0)

    # Output layer: Linear(8, 1)  (no activation)
    wb3 = wb3_ref[...]                                               # (1, 9)
    out = jnp.dot(wb3[:, :-1], h, preferred_element_type=jnp.float32) + wb3[:, -1:]
    o_ref[...] = out.astype(o_ref.dtype)                             # (1, bt)


@functools.partial(jax.jit, static_argnames=("batch_tile",))
def regressor_forward(x, params, *, batch_tile=2048):
    """Run the Regressor forward pass with a Pallas TPU kernel.

    x: (batch, input_size) float32
    params: list of (W, b) with W of shape (in, out), b of shape (1, out)
            (equivalent to PyTorch's y = x @ W_torch.T + b)
    returns: (batch, 1) float32
    """
    batch, input_size = x.shape

    # Clamp the tile so tiny batches are not massively over-padded, while
    # keeping it a multiple of 128 for lane-dense, unmasked blocks.
    batch_tile = min(batch_tile, _round_up(batch, 128))
    assert batch_tile % 128 == 0, "batch_tile must be a multiple of 128 (lane width)"

    grid_n = pl.cdiv(batch, batch_tile)
    padded = grid_n * batch_tile

    # Batch on the lane axis; zero-pad ragged batches (padded columns are
    # computed and then dropped in the wrapper).
    x_t = jnp.asarray(x, jnp.float32).T                              # (in, batch)
    if padded != batch:
        x_t = jnp.pad(x_t, ((0, 0), (0, padded - batch)))

    # Pack each layer's parameters into one grid-invariant array [W^T | b].
    wbs = [
        jnp.concatenate([w.T, b.T], axis=1).astype(jnp.float32)      # (out, in+1)
        for (w, b) in params
    ]

    def param_spec(arr):
        # Full-array block with a constant index_map -> fetched once, stays
        # resident in VMEM across all grid steps.
        return pl.BlockSpec(arr.shape, lambda i: (0, 0))

    out_t = pl.pallas_call(
        mlp_kernel,
        out_shape=jax.ShapeDtypeStruct((1, padded), jnp.float32),
        grid_spec=pl.GridSpec(
            grid=(grid_n,),
            in_specs=[pl.BlockSpec((input_size, batch_tile), lambda i: (0, i))]
                     + [param_spec(wb) for wb in wbs],
            out_specs=pl.BlockSpec((1, batch_tile), lambda i: (0, i)),
        ),
        compiler_params=pltpu.CompilerParams(
            dimension_semantics=("parallel",),
        ),
    )(x_t, *wbs)

    return out_t[:, :batch].T                                        # (batch, 1)


def init_params(key, input_size, neurons, output_size):
    """Deterministic init mimicking nn.Linear's U(-1/sqrt(fan_in), +1/sqrt(fan_in))."""
    dims = [input_size] + list(neurons) + [output_size]
    params = []
    for i in range(len(dims) - 1):
        fan_in, fan_out = dims[i], dims[i + 1]
        key, kw, kb = jax.random.split(key, 3)
        bound = 1.0 / jnp.sqrt(float(fan_in))
        w = jax.random.uniform(kw, (fan_in, fan_out), jnp.float32, -bound, bound)
        b = jax.random.uniform(kb, (1, fan_out), jnp.float32, -bound, bound)
        params.append((w, b))
    return params


def reference_forward(x, params):
    """Pure-JAX reference (full f32 precision)."""
    h = x
    n = len(params)
    for i, (w, b) in enumerate(params):
        h = jnp.dot(h, w, precision=jax.lax.Precision.HIGHEST) + b
        if i < n - 1:  # ReLU on all hidden layers (activations=['relu']*3)
            h = jnp.maximum(h, 0.0)
    return h


if __name__ == "__main__":
    # input_size = 13: 8 numeric housing features (after MinMax scaling)
    # + 5 one-hot categories of `ocean_proximity`, as in _preprocessor.
    batch = 300          # deliberately NOT a multiple of the tile -> exercises padding
    input_size = 13
    neurons = [8, 8, 8]
    output_size = 1

    key = jax.random.PRNGKey(0)
    key, kx = jax.random.split(key)
    # Preprocessed inputs are MinMax-scaled, so sample in [0, 1).
    x = jax.random.uniform(kx, (batch, input_size), jnp.float32)

    params = init_params(key, input_size, neurons, output_size)
    ref = reference_forward(x, params)

    # Multi-step grid with a small tile (grid = cdiv(300, 128) = 3 steps).
    out = regressor_forward(x, params, batch_tile=128)
    out = jax.block_until_ready(out)
    assert out.shape == (batch, 1)
    assert jnp.allclose(out, ref, atol=1e-4, rtol=1e-4), "mismatch vs JAX reference (tile=128)"

    # Default (large) tile: clamped to round_up(300, 128) = 384 -> single grid step.
    out_big = regressor_forward(x, params)
    out_big = jax.block_until_ready(out_big)
    assert out_big.shape == (batch, 1)
    assert jnp.allclose(out_big, ref, atol=1e-4, rtol=1e-4), "mismatch vs JAX reference (default tile)"

    print("KERNEL_OK")
</pallas_src>

<mosaic_0001>
module attributes {stable_mosaic.version = 11 : i64} {
  func.func @mlp_kernel(%arg0: i32, %arg1: memref<13x128xf32, #tpu.memory_space<vmem>>, %arg2: memref<8x14xf32, #tpu.memory_space<vmem>>, %arg3: memref<8x9xf32, #tpu.memory_space<vmem>>, %arg4: memref<8x9xf32, #tpu.memory_space<vmem>>, %arg5: memref<1x9xf32, #tpu.memory_space<vmem>>, %arg6: memref<1x128xf32, #tpu.memory_space<vmem>>) attributes {dimension_semantics = [#tpu.dimension_semantics<parallel>], iteration_bounds = array<i64: 3>, scalar_prefetch = 0 : i64, scratch_operands = 0 : i64, tpu.core_type = #tpu.core_type<tc>, window_params = [{transform_indices = @transform_0, window_bounds = array<i64: 13, 128>}, {pipeline_mode = #tpu.pipeline_mode<synchronous>, transform_indices = @transform_1, window_bounds = array<i64: 8, 14>}, {pipeline_mode = #tpu.pipeline_mode<synchronous>, transform_indices = @transform_2, window_bounds = array<i64: 8, 9>}, {pipeline_mode = #tpu.pipeline_mode<synchronous>, transform_indices = @transform_3, window_bounds = array<i64: 8, 9>}, {pipeline_mode = #tpu.pipeline_mode<synchronous>, transform_indices = @transform_4, window_bounds = array<i64: 1, 9>}, {transform_indices = @transform_5, window_bounds = array<i64: 1, 128>}]} {
    %c0 = arith.constant 0 : index
    %c0_0 = arith.constant 0 : index
    %0 = vector.load %arg1[%c0, %c0_0] : memref<13x128xf32, #tpu.memory_space<vmem>>, vector<13x128xf32>
    %c0_1 = arith.constant 0 : index
    %c0_2 = arith.constant 0 : index
    %1 = vector.load %arg2[%c0_1, %c0_2] : memref<8x14xf32, #tpu.memory_space<vmem>>, vector<8x14xf32>
    %2 = vector.extract_strided_slice %1 {offsets = [0, 0], sizes = [8, 13], strides = [1, 1]} : vector<8x14xf32> to vector<8x13xf32>
    %cst = arith.constant dense<0.000000e+00> : vector<8x128xf32>
    %3 = tpu.matmul %2, %0, %cst {dimension_numbers = #tpu.dot_dimension_numbers<[1], [0], [0], [1], [0, 0, 1, 1], [], []>} : vector<8x13xf32>, vector<13x128xf32>, vector<8x128xf32> -> vector<8x128xf32>
    %4 = vector.extract_strided_slice %1 {offsets = [0, 13], sizes = [8, 1], strides = [1, 1]} : vector<8x14xf32> to vector<8x1xf32>
    %5 = vector.broadcast %4 : vector<8x1xf32> to vector<8x128xf32>
    %6 = arith.addf %3, %5 : vector<8x128xf32>
    %cst_3 = arith.constant 0.000000e+00 : f32
    %7 = vector.broadcast %cst_3 : f32 to vector<8x128xf32>
    %8 = arith.maximumf %6, %7 : vector<8x128xf32>
    %c0_4 = arith.constant 0 : index
    %c0_5 = arith.constant 0 : index
    %9 = vector.load %arg3[%c0_4, %c0_5] : memref<8x9xf32, #tpu.memory_space<vmem>>, vector<8x9xf32>
    %10 = vector.extract_strided_slice %9 {offsets = [0, 0], sizes = [8, 8], strides = [1, 1]} : vector<8x9xf32> to vector<8x8xf32>
    %cst_6 = arith.constant dense<0.000000e+00> : vector<8x128xf32>
    %11 = tpu.matmul %10, %8, %cst_6 {dimension_numbers = #tpu.dot_dimension_numbers<[1], [0], [0], [1], [0, 0, 1, 1], [], []>} : vector<8x8xf32>, vector<8x128xf32>, vector<8x128xf32> -> vector<8x128xf32>
    %12 = vector.extract_strided_slice %9 {offsets = [0, 8], sizes = [8, 1], strides = [1, 1]} : vector<8x9xf32> to vector<8x1xf32>
    %13 = vector.broadcast %12 : vector<8x1xf32> to vector<8x128xf32>
    %14 = arith.addf %11, %13 : vector<8x128xf32>
    %cst_7 = arith.constant 0.000000e+00 : f32
    %15 = vector.broadcast %cst_7 : f32 to vector<8x128xf32>
    %16 = arith.maximumf %14, %15 : vector<8x128xf32>
    %c0_8 = arith.constant 0 : index
    %c0_9 = arith.constant 0 : index
    %17 = vector.load %arg4[%c0_8, %c0_9] : memref<8x9xf32, #tpu.memory_space<vmem>>, vector<8x9xf32>
    %18 = vector.extract_strided_slice %17 {offsets = [0, 0], sizes = [8, 8], strides = [1, 1]} : vector<8x9xf32> to vector<8x8xf32>
    %cst_10 = arith.constant dense<0.000000e+00> : vector<8x128xf32>
    %19 = tpu.matmul %18, %16, %cst_10 {dimension_numbers = #tpu.dot_dimension_numbers<[1], [0], [0], [1], [0, 0, 1, 1], [], []>} : vector<8x8xf32>, vector<8x128xf32>, vector<8x128xf32> -> vector<8x128xf32>
    %20 = vector.extract_strided_slice %17 {offsets = [0, 8], sizes = [8, 1], strides = [1, 1]} : vector<8x9xf32> to vector<8x1xf32>
    %21 = vector.broadcast %20 : vector<8x1xf32> to vector<8x128xf32>
    %22 = arith.addf %19, %21 : vector<8x128xf32>
    %cst_11 = arith.constant 0.000000e+00 : f32
    %23 = vector.broadcast %cst_11 : f32 to vector<8x128xf32>
    %24 = arith.maximumf %22, %23 : vector<8x128xf32>
    %c0_12 = arith.constant 0 : index
    %c0_13 = arith.constant 0 : index
    %25 = vector.load %arg5[%c0_12, %c0_13] : memref<1x9xf32, #tpu.memory_space<vmem>>, vector<1x9xf32>
    %26 = vector.extract_strided_slice %25 {offsets = [0, 0], sizes = [1, 8], strides = [1, 1]} : vector<1x9xf32> to vector<1x8xf32>
    %cst_14 = arith.constant dense<0.000000e+00> : vector<1x128xf32>
    %27 = tpu.matmul %26, %24, %cst_14 {dimension_numbers = #tpu.dot_dimension_numbers<[1], [0], [0], [1], [0, 0, 1, 1], [], []>} : vector<1x8xf32>, vector<8x128xf32>, vector<1x128xf32> -> vector<1x128xf32>
    %28 = vector.extract_strided_slice %25 {offsets = [0, 8], sizes = [1, 1], strides = [1, 1]} : vector<1x9xf32> to vector<1x1xf32>
    %29 = vector.broadcast %28 : vector<1x1xf32> to vector<1x128xf32>
    %30 = arith.addf %27, %29 : vector<1x128xf32>
    %c0_15 = arith.constant 0 : index
    %c0_16 = arith.constant 0 : index
    %31 = vector.load %arg6[%c0_15, %c0_16] : memref<1x128xf32, #tpu.memory_space<vmem>>, vector<1x128xf32>
    tpu.vector_store %arg6[%c0_15, %c0_16], %30 {strides = array<i32>} : memref<1x128xf32, #tpu.memory_space<vmem>>, vector<1x128xf32>,
    return
  }
  func.func @transform_0(%arg0: i32) -> (i32, i32) {
    %c0_i32 = arith.constant 0 : i32
    %c0_i32_0 = arith.constant 0 : i32
    return %c0_i32, %arg0 : i32, i32
  }
  func.func @transform_1(%arg0: i32) -> (i32, i32) {
    %c0_i32 = arith.constant 0 : i32
    %c0_i32_0 = arith.constant 0 : i32
    %c0_i32_1 = arith.constant 0 : i32
    return %c0_i32, %c0_i32_0 : i32, i32
  }
  func.func @transform_2(%arg0: i32) -> (i32, i32) {
    %c0_i32 = arith.constant 0 : i32
    %c0_i32_0 = arith.constant 0 : i32
    %c0_i32_1 = arith.constant 0 : i32
    return %c0_i32, %c0_i32_0 : i32, i32
  }
  func.func @transform_3(%arg0: i32) -> (i32, i32) {
    %c0_i32 = arith.constant 0 : i32
    %c0_i32_0 = arith.constant 0 : i32
    %c0_i32_1 = arith.constant 0 : i32
    return %c0_i32, %c0_i32_0 : i32, i32
  }
  func.func @transform_4(%arg0: i32) -> (i32, i32) {
    %c0_i32 = arith.constant 0 : i32
    %c0_i32_0 = arith.constant 0 : i32
    %c0_i32_1 = arith.constant 0 : i32
    return %c0_i32, %c0_i32_0 : i32, i32
  }
  func.func @transform_5(%arg0: i32) -> (i32, i32) {
    %c0_i32 = arith.constant 0 : i32
    %c0_i32_0 = arith.constant 0 : i32
    return %c0_i32, %arg0 : i32, i32
  }
}

</mosaic_0001>

<bundles_post_ra>
// kernel: regressor_forward.1
= control target key start
LH: loop header
LB: loop body
LE: loop exit
PB: predicated region body
PF: predicated region fallthrough
CT: control target
= control target key end

     0   :  { %s776_s18 = smov 0   ;;  %s778_s19 = smov 0   ;;  %s849_s0 = inlined_call_operand.vmem [shape: f32[13,384], index: 0, kind: input, shape index: {}]   ;;  %s850_s1 = inlined_call_operand.vmem [shape: f32[8,14], index: 1, kind: input, shape index: {}]   ;;  %s851_s2 = inlined_call_operand.vmem [shape: f32[8,9], index: 2, kind: input, shape index: {}]   ;;  %s852_s3 = inlined_call_operand.vmem [shape: f32[8,9], index: 3, kind: input, shape index: {}]   ;;  %s853_s4 = inlined_call_operand.vmem [shape: f32[1,9], index: 4, kind: input, shape index: {}]   ;;  %s854_s5 = inlined_call_operand.vmem [shape: f32[1,384], index: 5, kind: output, shape index: {}]  }
   0x1   :  { %s780_s20 = smov 0  }
   0x2 LB: > { %s641_s21 = sadd.s32 4294967295, %s740_s20   ;;  %s793_s22 = sadd.s32 1, %s740_s20   ;;  %s740_s20 = sphi %s780_s20, %s857_s20   ;;  %s736_s19 = sphi %s778_s19, %s856_s19   ;;  %s732_s18 = sphi %s776_s18, %s855_s18  }
   0x3   : > { %s19_s23 = ssub.s32 %s740_s20, %s793_s22  ;;  %s22_s24 = sadd.s32 1, %s736_s19 }
   0x4   : > { %p20_p0 = scmp.eq.s32.totalorder %s19_s23, 0  ;;  %p29_p1 = scmp.ne.s32.totalorder %s736_s19, %s732_s18 }
   0x5   : > { %p30_p2 = scmp.eq.s32.totalorder %s740_s20, 0  ;;  %p644_p4 = scmp.ge.s32.totalorder %s740_s20, 3 }
   0x6   : > { %s802_s25 = scalar_select %p20_p0, %s736_s19, %s22_s24  }
   0x7   : > { %p31_p3 = por %p30_p2, %p29_p1  ;;  %177 = sbr.rel (%p644_p4) target bundleno = 17 (0x11), region = 32 }
   0xc   : > { %180 = sbr.rel (!%p31_p3) target bundleno = 17 (0x11), region = 36  ;;  %s182_s26 = sand.u32 (%p31_p3), 1, %s736_s19  }
   0xd   : > { %s646_s27 = sshll.u32 (%p31_p3), %s740_s20, 3  ;;  %s645_s28 = sshll.u32 (%p31_p3), %s182_s26, 4 }
   0xe   : > { %s186_s6 = scalar_lea.vmem (%p31_p3), %s849_s0, %s646_s27  ;;  %s184_s7 = scalar_lea.vmem (%p31_p3), [#allocation2], %s645_s28 }
   0xf   : > { %v217_v0 = vld [vmem:[%s186_s6] sm:$0xff] (%p31_p3)  ;;  %v219_v1 = vld [vmem:[%s186_s6 + $0x18] sm:$0xff] (%p31_p3) }
  0x10   : > { %218 = vst [vmem:[%s184_s7] sm:$0xff] (%p31_p3), %v217_v0  ;;  %220 = vst [vmem:[%s184_s7 + $0x8] sm:$0xff] (%p31_p3), %v219_v1 }
  0x11 PF: > { %p647_p5 = scmp.ge.s32.totalorder %s740_s20, 1  ;;  %p225_p6 = scmp.lt.s32.totalorder %s740_s20, 4 }
  0x13   : > { %p226_p7 = pnand %p647_p5, %p225_p6 }
  0x14   : > { %s232_s8 = sand.u32 (!%p226_p7), 1, %s732_s18   ;;  %p257_p8 = scmp.lt.s32.totalorder (!%p226_p7), %s641_s21, 2 }
  0x15   : > { %229 = sbr.rel (%p226_p7) target bundleno = 823 (0x337), region = 74  ;;  %s648_s9 = sshll.u32 (!%p226_p7), %s232_s8, 4 }
  0x16   : > { %s234_s12 = scalar_lea.vmem (!%p226_p7), [#allocation2], %s648_s9 }
  0x1a   : > { %v742_v2 = vmov 0.0   ;;  %vm271_vm0 = vcmask 1044480   ;;  %vm743_vm1 = vmmov 0   ;;  %v262_v3 = vld [vmem:[%s850_s1] sm:$0xff]  ;;  %v744_v4 = vmov 13   ;;  %s859_s21 = smov (!%p257_p8, %s641_s21), 2 }
  0x1b   : > { %665 = vmatprep.subr.mxu0 %v742_v2  ;;  %669 = vmatprep.mubr.msk.f32.mxu0 %vm743_vm1, %v742_v2  ;;  %v261_v5 = vld [vmem:[%s234_s12 + $0x8] sm:$0x1f]  ;;  %v260_v6 = vld [vmem:[%s234_s12] sm:$0xff]  ;;  %vm268_vm2 = vcmask 105472   ;;  %v745_v8 = vmov 8   ;;  %vm352_vm3 = vcmask 64512   ;;  %v511_v26 = vlaneseq  ;;  %s259_s26 = scalar_lea.vmem %s854_s5, %s859_s21 }
  0x1c   : > { %715 = vset.pattern.permute.xlu0 %v744_v4  ;;  %672 = vmatprep.subr.mxu1 %v742_v2  ;;  %v346_v7 = vld [vmem:[%s851_s2] sm:$0xff] }
  0x1d   : > { %265 = vperm.xlu0 %715, %v262_v3   ;;  %674 = vmatprep.mubr.msk.f32.mxu1 %vm743_vm1, %v742_v2  ;;  %v426_v14 = vld [vmem:[%s852_s3] sm:$0xff]  ;;  %v512_v27 = vshrl.u32 %v511_v26, 7 }
  0x1e   : > { %666 = vmatpush3.msk.msra.mxu0 %vm271_vm0, %v261_v5  ;;  %717 = vset.pattern.permute.xlu1 %v745_v8  ;;  %v505_v15 = vld [vmem:[%s853_s4] sm:$0x1] }
  0x1f   : > { %667 = vmatprep.subr.mxu0 %v742_v2  ;;  %429 = vperm.xlu1 %717, %v426_v14   ;;  %v513_v28 = vsub.s32 0, %v512_v27 }
  0x20   : > { %668 = vmatpush3.msra.mxu0 %v260_v6 }
  0x21   : > { %670 = vmatmul.mubr.msk.f32.vlgmr.msra.gmra.mxu0 %vm268_vm2, %v262_v3  ;;  %682 = vmatprep.subr.mxu0 %v742_v2 }
  0x22   : > { %684 = vmatprep.mubr.msk.f32.mxu0 %vm743_vm1, %v742_v2  ;;  %716 = vset.pattern.permute.xlu0 %v745_v8 }
  0x23   : > { %349 = vperm.xlu0 %716, %v346_v7   ;;  %508 = vperm.xlu1 %717, %v505_v15  }
  0x98   : > { %v266_v9 = vpop.permute.xlu0 %265 }
  0x9a   : > { %v430_v21 = vpop.permute.xlu1 %429 }
  0x9e   : > { %v350_v16 = vpop.permute.xlu0 %349  ;;  %v509_v29 = vpop.permute.xlu1 %508 }
  0x9f   : > { %v514_v30 = vrot.slane %v509_v29, %v513_v28 }
  0xe1   : > { %v341_v10 = vpop.f32.mrf.mxu0 }
  0xe2   : > { %v342_v11 = vadd.f32 %v341_v10, %v266_v9 }
  0xe3   : > { %v671_v12 = vpop.f32.mrf.mxu0 }
  0xe4   : > { %v345_v13 = vmax.f32 %v342_v11, 0.0 }
  0xe6   : > { %673 = vmatpush3.msra.mxu1 %v345_v13 }
  0xe7   : > { %675 = vmatmul.mubr.msk.f32.vlgmr.msra.gmra.mxu1 %vm352_vm3, %v346_v7  ;;  %677 = vmatprep.subr.mxu1 %v742_v2 }
  0xe8   : > { %679 = vmatprep.mubr.msk.f32.mxu1 %vm743_vm1, %v742_v2 }
 0x1a7   : > { %v421_v17 = vpop.f32.mrf.mxu1 }
 0x1a8   : > { %v422_v18 = vadd.f32 %v421_v17, %v350_v16 }
 0x1a9   : > { %v676_v19 = vpop.f32.mrf.mxu1 }
 0x1aa   : > { %v425_v20 = vmax.f32 %v422_v18, 0.0 }
 0x1ac   : > { %678 = vmatpush3.msra.mxu1 %v425_v20 }
 0x1ad   : > { %680 = vmatmul.mubr.msk.f32.vlgmr.msra.gmra.mxu1 %vm352_vm3, %v426_v14 }
 0x26d   : > { %v500_v22 = vpop.f32.mrf.mxu1 }
 0x26e   : > { %v501_v23 = vadd.f32 %v500_v22, %v430_v21 }
 0x26f   : > { %v681_v24 = vpop.f32.mrf.mxu1 }
 0x270   : > { %v504_v25 = vmax.f32 %v501_v23, 0.0 }
 0x272   : > { %683 = vmatpush3.msra.mxu0 %v504_v25 }
 0x273   : > { %685 = vmatmul.mubr.msk.f32.vlgmr.msra.gmra.mxu0 %vm352_vm3, %v505_v15 }
 0x333   : > { %v583_v31 = vpop.f32.mrf.mxu0 }
 0x334   : > { %v584_v32 = vadd.f32 %v583_v31, %v514_v30 }
 0x335   : > { %v686_v33 = vpop.f32.mrf.mxu0 }
 0x336   : > { %587 = vst [vmem:[%s259_s26] sm:$0x1] %v584_v32 }
 0x337 PF: > { %p12_p9 = scmp.ge.s32.totalorder %s793_s22, 5   ;;  %s855_s18 = smov %s736_s19 }
 0x338   : > { %s856_s19 = smov %s802_s25  ;;  %s857_s20 = smov %s793_s22 }
 0x339   :  { %14 = sbr.rel (!%p12_p9) target bundleno = 2 (0x2), region = 113 }

</bundles_post_ra>
